<compile_context>
chip_gen: v5e
topology: v5e:2x2
jax: 0.10.0
libtpu: 0.0.40
codegen_flags: <defaults>
</compile_context>

<pallas_src>
import functools

import jax
import jax.numpy as jnp
from jax.experimental import pallas as pl
from jax.experimental.pallas import tpu as pltpu


def _round_up(x, m):
    return ((x + m - 1) // m) * m


# --------------------------------------------------------------------------- #
# Kernel 1: row-tiled L2 normalization, f32 math -> bf16 MXU operands.
# --------------------------------------------------------------------------- #
def _normalize_kernel(f_ref, fn_ref):
    f = f_ref[...].astype(jnp.float32)                         # (tm, Dp)
    ssq = jnp.sum(f * f, axis=-1, keepdims=True)               # (tm, 1)
    # rsqrt runs on the EUP (free slot); guard keeps zero (padded) rows finite.
    # TODO(synk): genuinely zero-norm input rows map to 0 here (PyTorch would
    # propagate NaN); needed so padded rows cannot poison valid rows' softmax.
    inv = jnp.where(ssq > 0.0, jax.lax.rsqrt(ssq), jnp.float32(0.0))
    fn_ref[...] = (f * inv).astype(fn_ref.dtype)


# --------------------------------------------------------------------------- #
# Kernel 2: per-row-tile logits + masked log-softmax + positive-column select.
# --------------------------------------------------------------------------- #
def _loss_kernel(fn_all_ref, fn_tile_ref, pos_ref, out_ref, *, inv_temp, valid_rows):
    tm = fn_tile_ref.shape[0]
    Bp = fn_all_ref.shape[0]
    row0 = pl.program_id(0) * tm                               # global row offset

    # Fold 1/temperature into the LHS tile (tm x D) instead of a (tm x B) multiply.
    lhs = (fn_tile_ref[...].astype(jnp.float32) * jnp.float32(inv_temp)
           ).astype(jnp.bfloat16)                              # (tm, Dp) bf16

    # logits tile = (fn_tile / T) @ fn_all^T ; bf16 operands, f32 accumulation.
    logits = jax.lax.dot_general(
        lhs, fn_all_ref[...], (((1,), (1,)), ((), ())),
        preferred_element_type=jnp.float32)                    # (tm, Bp) f32

    col = jax.lax.broadcasted_iota(jnp.int32, (tm, Bp), 1)     # single (tm,Bp) iota
    row = jax.lax.broadcasted_iota(jnp.int32, (tm, 1), 0) + row0

    invalid = col == row                                       # self-similarity
    if Bp > valid_rows:                                        # padded columns
        invalid = invalid | (col >= valid_rows)
    logits = jnp.where(invalid, jnp.float32(-jnp.inf), logits)

    # Stable row-wise logsumexp.
    row_max = jnp.max(logits, axis=-1, keepdims=True)          # (tm, 1)
    shifted = logits - row_max
    lse = jnp.log(jnp.sum(jnp.exp(shifted), axis=-1, keepdims=True))

    # Value of `shifted` at the positive column (exactly one match per row);
    # a where-select, so no dense labels matrix and no 0*(-inf).
    pos_shifted = jnp.sum(jnp.where(col == pos_ref[...], shifted, jnp.float32(0.0)),
                          axis=-1, keepdims=True)              # (tm, 1)

    # per-row loss = -log_softmax(logits)[r, pos[r]] = lse - shifted[pos]
    out_ref[...] = lse - pos_shifted


# --------------------------------------------------------------------------- #
# Wrapper
# --------------------------------------------------------------------------- #
def evaluator_loss(features, positive_indices, temperature=0.07, block_rows=256):
    B, D = features.shape

    # Row tile: multiple of 8 (sublane), capped at block_rows; pad shapes.
    tm = min(block_rows, _round_up(B, 8))
    tm = max(8, (tm // 8) * 8)
    Bp = _round_up(B, tm)
    Dp = _round_up(D, 128)                # zero columns don't change norms / dots
    n_tiles = Bp // tm

    f = features.astype(jnp.float32)
    if (Bp, Dp) != (B, D):
        f = jnp.pad(f, ((0, Bp - B), (0, Dp - D)))
    pos = positive_indices.astype(jnp.int32).reshape(-1, 1)
    if Bp != B:
        pos = jnp.pad(pos, ((0, Bp - B), (0, 0)))

    # ---- kernel 1: normalize -> bf16 ------------------------------------- #
    fn = pl.pallas_call(
        _normalize_kernel,
        out_shape=jax.ShapeDtypeStruct((Bp, Dp), jnp.bfloat16),
        grid=(n_tiles,),
        in_specs=[pl.BlockSpec((tm, Dp), lambda i: (i, 0))],
        out_specs=pl.BlockSpec((tm, Dp), lambda i: (i, 0)),
        compiler_params=pltpu.CompilerParams(dimension_semantics=("parallel",)),
    )(f)

    # ---- kernel 2: row-tiled loss ----------------------------------------- #
    vmem_need = (
        2 * Bp * Dp * 2          # resident normalized slab (+ buffer headroom)
        + 4 * tm * Dp * 2        # double-buffered LHS tile
        + 6 * tm * Bp * 4        # logits tile + elementwise temporaries
    )
    vmem_limit = int(min(64 * 2**20, max(32 * 2**20, 2 * vmem_need)))

    per_row = pl.pallas_call(
        functools.partial(_loss_kernel,
                          inv_temp=1.0 / float(temperature),
                          valid_rows=B),
        out_shape=jax.ShapeDtypeStruct((Bp, 1), jnp.float32),
        grid=(n_tiles,),
        in_specs=[
            pl.BlockSpec((Bp, Dp), lambda i: (0, 0)),   # full normalized slab, resident
            pl.BlockSpec((tm, Dp), lambda i: (i, 0)),   # this step's row tile
            pl.BlockSpec((tm, 1), lambda i: (i, 0)),    # positive indices tile
        ],
        out_specs=pl.BlockSpec((tm, 1), lambda i: (i, 0)),
        compiler_params=pltpu.CompilerParams(
            dimension_semantics=("parallel",),
            vmem_limit_bytes=vmem_limit,
        ),
    )(fn, fn, pos)

    # per_row[i] = -log_softmax(logits_i)[pos_i]; mean over the valid rows only.
    return jnp.sum(per_row[:B, 0]) / jnp.float32(B)


# --------------------------------------------------------------------------- #
# Pure-JAX reference (intended semantics of the PyTorch forward).
# --------------------------------------------------------------------------- #
def evaluator_loss_ref(features, positive_indices, temperature=0.07):
    f = features / jnp.linalg.norm(features, axis=-1, keepdims=True)
    sim = f @ f.T
    B = f.shape[0]
    sim = jnp.where(jnp.eye(B, dtype=bool), -jnp.inf, sim)
    log_sm = jax.nn.log_softmax(sim / temperature, axis=-1)
    pos_lp = jnp.take_along_axis(
        log_sm, positive_indices.reshape(-1, 1).astype(jnp.int32), axis=-1)[:, 0]
    return -jnp.mean(pos_lp)


if __name__ == "__main__":
    B, D = 8, 32
    key = jax.random.PRNGKey(0)
    k_feat, _ = jax.random.split(key)
    features = jax.random.normal(k_feat, (B, D), dtype=jnp.float32)
    # positive pair for sample i is sample (i+1) % B (deterministic, never self)
    positive_indices = (jnp.arange(B, dtype=jnp.int32) + 1) % B

    loss = evaluator_loss(features, positive_indices, temperature=0.07)
    loss = jax.block_until_ready(loss)

    ref = evaluator_loss_ref(features, positive_indices, temperature=0.07)
    ref = jax.block_until_ready(ref)

    # bf16 MXU operands => relaxed tolerance vs the f32 reference.
    assert bool(jnp.isfinite(loss)), loss
    assert bool(jnp.allclose(loss, ref, rtol=5e-2, atol=5e-2)), (loss, ref)
    print("KERNEL_OK")
</pallas_src>

<mosaic_0001>
module attributes {stable_mosaic.version = 11 : i64} {
  func.func @_normalize_kernel(%arg0: i32, %arg1: memref<8x128xf32, #tpu.memory_space<vmem>>, %arg2: memref<8x128xbf16, #tpu.memory_space<vmem>>) attributes {dimension_semantics = [#tpu.dimension_semantics<parallel>], iteration_bounds = array<i64: 1>, scalar_prefetch = 0 : i64, scratch_operands = 0 : i64, tpu.core_type = #tpu.core_type<tc>, window_params = [{transform_indices = @transform_0, window_bounds = array<i64: 8, 128>}, {transform_indices = @transform_1, window_bounds = array<i64: 8, 128>}]} {
    %c0 = arith.constant 0 : index
    %c0_0 = arith.constant 0 : index
    %0 = vector.load %arg1[%c0, %c0_0] : memref<8x128xf32, #tpu.memory_space<vmem>>, vector<8x128xf32>
    %1 = arith.mulf %0, %0 : vector<8x128xf32>
    %cst = arith.constant dense<0.000000e+00> : vector<8xf32>
    %2 = vector.multi_reduction <add>, %1, %cst [1] : vector<8x128xf32> to vector<8xf32>
    %3 = vector.shape_cast %2 : vector<8xf32> to vector<8x1xf32>
    %cst_1 = arith.constant 0.000000e+00 : f32
    %4 = vector.broadcast %cst_1 : f32 to vector<8x1xf32>
    %5 = arith.cmpf ogt, %3, %4 : vector<8x1xf32>
    %6 = math.rsqrt %3 : vector<8x1xf32>
    %cst_2 = arith.constant 0.000000e+00 : f32
    %7 = vector.broadcast %cst_2 : f32 to vector<8x1xf32>
    %8 = arith.select %5, %6, %7 : vector<8x1xi1>, vector<8x1xf32>
    %9 = vector.broadcast %8 : vector<8x1xf32> to vector<8x128xf32>
    %10 = arith.mulf %0, %9 : vector<8x128xf32>
    %11 = arith.truncf %10 : vector<8x128xf32> to vector<8x128xbf16>
    %c0_3 = arith.constant 0 : index
    %c0_4 = arith.constant 0 : index
    %12 = vector.load %arg2[%c0_3, %c0_4] : memref<8x128xbf16, #tpu.memory_space<vmem>>, vector<8x128xbf16>
    tpu.vector_store %arg2[%c0_3, %c0_4], %11 {strides = array<i32>} : memref<8x128xbf16, #tpu.memory_space<vmem>>, vector<8x128xbf16>,
    return
  }
  func.func @transform_0(%arg0: i32) -> (i32, i32) {
    %c0_i32 = arith.constant 0 : i32
    %c0_i32_0 = arith.constant 0 : i32
    return %arg0, %c0_i32 : i32, i32
  }
  func.func @transform_1(%arg0: i32) -> (i32, i32) {
    %c0_i32 = arith.constant 0 : i32
    %c0_i32_0 = arith.constant 0 : i32
    return %arg0, %c0_i32 : i32, i32
  }
}

</mosaic_0001>

<bundles_post_ra>
// kernel: tpu_custom_call.1
= control target key start
LH: loop header
LB: loop body
LE: loop exit
PB: predicated region body
PF: predicated region fallthrough
CT: control target
= control target key end

     0   :  { %6 = vsyncpa [#allocation3], 0  ;;  %s133_s0 = inlined_call_operand.hbm [shape: f32[8,128], index: 0, kind: input, shape index: {}]   ;;  %s134_s1 = inlined_call_operand.hbm [shape: bf16[8,128], index: 1, kind: output, shape index: {}]  }
   0x1   :  { %7 = vsyncpa [#allocation4], 0  ;;  %s13_s8 = sshll.u32 %s133_s0, 4  ;;  %s115_s9 = smov [#allocation2]   ;;  %s14_s8 = int_to_ptr.hbm [resolvable:$true] %s13_s8 }
   0x2   :  { %s15_s10 = sshll.u32 %s115_s9, 4  ;;  %s16_s10 = int_to_ptr.vmem [resolvable:$true] %s15_s10 }
   0x3   :  { %18 = dma.hbm_to_vmem [thread:$0]  %s14_s8, 128, %s16_s10, [#allocation3]  }
   0x4   :  { %111 = dma.done.wait [#allocation3], 128  }
   0x5   :  { %112 = vsyncadd [#allocation3], 4294967168  ;;  %v23_v0 = vld [vmem:[#allocation2] sm:$0xff]  ;;  %s116_s0 = smov [#allocation5]   ;;  %s49_s14 = sshll.u32 %s134_s1, 4  ;;  %s50_s14 = int_to_ptr.hbm [resolvable:$true] %s49_s14 }
   0x6   :  { %v24_v1 = vmul.f32 %v23_v0, %v23_v0  ;;  %s47_s11 = sshll.u32 %s116_s0, 4  ;;  %s48_s11 = int_to_ptr.vmem [resolvable:$true] %s47_s11 }
   0x8   :  { %25 = vadd.xlane.f32.xlu0 %v24_v1 }
  0x7b   :  { %v26_v2 = vpop.xlane.xlu0 %25 }
  0x7c   :  { %61 = vrsqrt.f32 %v26_v2  ;;  %vm34_vm1 = vweird.f32 %v26_v2  ;;  %vm27_vm3 = vcmp.gt.f32.partialorder %v26_v2, 0.0 }
  0x82   :  { %v62_v3 = vpop.eup %61 }
  0x83   :  { %v29_v4 = vmul.f32 %v62_v3, %v26_v2  ;;  %vm35_vm0 = vweird.f32 %v62_v3 }
  0x84   :  { %vm36_vm2 = vmor %vm34_vm1, %vm35_vm0 }
  0x85   :  { %v30_v5 = vmul.f32 %v62_v3, %v29_v4 }
  0x87   :  { %v31_v6 = vmul.f32 0.5, %v30_v5 }
  0x89   :  { %v32_v7 = vsub.f32 1.5, %v31_v6 }
  0x8b   :  { %v33_v8 = vmul.f32 %v62_v3, %v32_v7 }
  0x8d   :  { %v37_v9 = vsel %vm36_vm2, %v62_v3, %v33_v8 }
  0x8e   :  { %v38_v10 = vsel %vm27_vm3, %v37_v9, 0.0 }
  0x8f   :  { %v39_v11 = vmul.f32 %v38_v10, %v23_v0 }
  0x91   :  { %v40_v12 = vpack.c.bf16 %v39_v11, %v39_v11 }
  0x93   :  { %41 = vst [vmem:[#allocation5] sm:$0xf] %v40_v12 }
  0x94   :  { %52 = dma.vmem_to_hbm [thread:$0]  %s48_s11, 64, %s50_s14, [#allocation4]  }
  0x95   :  { %113 = dma.done.wait [#allocation4], 64  }
  0x96   :  { %114 = vsyncadd [#allocation4], 4294967232 }
  0x97   :  { %57 = vsyncpa [#allocation3], 1 }
  0x98   :  { %58 = vsyncpa [#allocation4], 1 }

</bundles_post_ra>
